<compile_context>
chip_gen: v7x
topology: tpu7x:2x2x1
jax: 0.10.0
libtpu: 0.0.40
codegen_flags: <defaults>
</compile_context>

<pallas_src>
import functools

import jax
import jax.numpy as jnp
from jax.experimental import pallas as pl
from jax.experimental.pallas import tpu as pltpu


def _round_up(x, m):
    return ((x + m - 1) // m) * m


def le_conv_kernel(src_ref, comm_ref, wc_ref, w3t_ref, out_ref, *, k, c_in):
    src = src_ref[...]                               # (tn, c_in)
    comm = comm_ref[...]                             # (tn, k * c_in), lane-dense

    # K-sum over the community members: K-1 plain vreg adds on static lane
    # slices (no sublane padding, no XLU relayout).
    comm_sum = comm[:, :c_in]
    for kk in range(1, k):
        comm_sum = comm_sum + comm[:, kk * c_in:(kk + 1) * c_in]

    wc = wc_ref[...]                                 # (c_in, c_out) == (W1 + K*W2).T
    w3t = w3t_ref[...]                               # (c_in, c_out) == W3.T

    src_term = jnp.dot(src, wc, preferred_element_type=jnp.float32)
    comm_term = jnp.dot(comm_sum, w3t, preferred_element_type=jnp.float32)

    out_ref[...] = (src_term - comm_term).astype(out_ref.dtype)


def _vmem_budget_bytes():
    """Generation-aware VMEM budget for tile sizing (leave headroom for the
    compiler's own scratch).  ~76 MiB on v5e/v6e (128 MiB physical),
    ~38 MiB on v7x (64 MiB per TensorCore)."""
    try:
        cap = pltpu.get_tpu_info().vmem_capacity_bytes
    except Exception:
        cap = 64 << 20          # conservative fallback: assume v7x-like 64 MiB
    return max(16 << 20, int(cap * 0.6))


def _pick_tile(n, k, c_in_p, c_out_p, itemsize, vmem_budget_bytes):
    """Largest row-tile that (a) fits the VMEM budget with double-buffered
    streams, (b) is a multiple of 8, and (c) leaves >= 4 grid steps when N
    allows (megacore sharding on v7x + prefetch/compute overlap per core)."""
    # Fixed: two weight blocks, double-buffered by the pipeline.
    fixed = 2 * 2 * c_in_p * c_out_p * itemsize
    # Per row: double-buffered src / community / output blocks ...
    per_row = 2 * (c_in_p + k * c_in_p + c_out_p) * itemsize
    # ... plus in-kernel f32 temporaries (comm_sum, src_term, comm_term).
    per_row += (c_in_p + 2 * c_out_p) * 4
    avail = max(vmem_budget_bytes - fixed, 8 * per_row)
    cap = max(8, (avail // per_row) // 8 * 8)
    if n >= 32:
        # Guarantee >= 4 grid steps so both v7x TensorCores get work and
        # double-buffering stays effective.
        cap = min(cap, max(8, (n // 4) // 8 * 8))
    tn = min(cap, _round_up(n, 8))
    return max(8, (tn // 8) * 8)


def le_conv_forward(source, community, w1, w2, w3, *, tn=None):
    n, c_in = source.shape
    _, k, _ = community.shape
    c_out = w1.shape[0]
    dtype = source.dtype
    itemsize = jnp.dtype(dtype).itemsize

    # Lane-dense padded channel dims (sliced off at the end; exact).
    c_in_p = _round_up(c_in, 128)
    c_out_p = _round_up(c_out, 128)

    budget = _vmem_budget_bytes()
    if tn is None:
        tn = _pick_tile(n, k, c_in_p, c_out_p, itemsize, budget)
    tn = max(8, (tn // 8) * 8)
    n_pad = _round_up(n, tn)
    grid_n = n_pad // tn

    # Fold W1/W2 and pre-transpose once in plain XLA:
    #   fitness = src @ (W1 + K*W2).T - comm_sum @ W3.T
    wc = (w1 + float(k) * w2).T.astype(dtype)        # (c_in, c_out)
    w3t = w3.T.astype(dtype)                         # (c_in, c_out)

    # Zero-padding: row/out-dim padding is sliced off afterwards; in-dim
    # padding (matched by zero weight rows) contributes exactly nothing.
    src_p = jnp.zeros((n_pad, c_in_p), dtype).at[:n, :c_in].set(source)
    comm_p = jnp.zeros((n_pad, k, c_in_p), dtype).at[:n, :, :c_in].set(community)
    comm_p = comm_p.reshape(n_pad, k * c_in_p)       # lane-dense 2-D slab
    wc_p = jnp.zeros((c_in_p, c_out_p), dtype).at[:c_in, :c_out].set(wc)
    w3t_p = jnp.zeros((c_in_p, c_out_p), dtype).at[:c_in, :c_out].set(w3t)

    # Advisory cost: 2 matmuls; HBM bytes dominated by the community stream.
    flops = 2 * (2 * n_pad * c_in_p * c_out_p)
    bytes_accessed = (
        n_pad * c_in_p * itemsize
        + n_pad * k * c_in_p * itemsize
        + n_pad * c_out_p * itemsize
        + 2 * c_in_p * c_out_p * itemsize
    )

    vmem_limit = min(budget + (8 << 20), 120 << 20)

    out_p = pl.pallas_call(
        functools.partial(le_conv_kernel, k=k, c_in=c_in_p),
        out_shape=jax.ShapeDtypeStruct((n_pad, c_out_p), dtype),
        grid_spec=pltpu.PrefetchScalarGridSpec(
            num_scalar_prefetch=0,
            grid=(grid_n,),
            in_specs=[
                pl.BlockSpec((tn, c_in_p), lambda i: (i, 0)),
                pl.BlockSpec((tn, k * c_in_p), lambda i: (i, 0)),
                pl.BlockSpec((c_in_p, c_out_p), lambda i: (0, 0)),
                pl.BlockSpec((c_in_p, c_out_p), lambda i: (0, 0)),
            ],
            out_specs=pl.BlockSpec((tn, c_out_p), lambda i: (i, 0)),
        ),
        compiler_params=pltpu.CompilerParams(
            dimension_semantics=("parallel",),
            vmem_limit_bytes=vmem_limit,
        ),
        cost_estimate=pl.CostEstimate(
            flops=flops, transcendentals=0, bytes_accessed=bytes_accessed
        ),
    )(src_p, comm_p, wc_p, w3t_p)

    return out_p[:n, :c_out]


def reference_forward(source, community, w1, w2, w3):
    # Pure-JAX reference mirroring the PyTorch code path (per-k subtraction).
    n = source.shape[0]
    c_out = w1.shape[0]
    src_score = source @ w1.T
    src_score1 = source @ w2.T
    comm_flat = community.reshape(-1, community.shape[-1])
    community_scores = (comm_flat @ w3.T).reshape(n, -1, c_out)
    community_score = (src_score1[:, None, :] - community_scores).sum(axis=1)
    return src_score + community_score


if __name__ == "__main__":
    key = jax.random.PRNGKey(0)
    k_src, k_comm, k_w1, k_w2, k_w3 = jax.random.split(key, 5)

    # Small but lane-dense demo shapes; N=256 gives a 4-step grid (tn=64) so
    # both v7x TensorCores get work and pipelining is exercised.
    N, K, C_IN, C_OUT = 256, 4, 128, 128

    source = jax.random.normal(k_src, (N, C_IN), dtype=jnp.float32)
    community = jax.random.normal(k_comm, (N, K, C_IN), dtype=jnp.float32)

    # nn.Linear(in, out, bias=False) weights: shape (out, in), U(-1/sqrt(in), 1/sqrt(in))
    bound = 1.0 / (C_IN ** 0.5)
    w1 = jax.random.uniform(k_w1, (C_OUT, C_IN), jnp.float32, -bound, bound)
    w2 = jax.random.uniform(k_w2, (C_OUT, C_IN), jnp.float32, -bound, bound)
    w3 = jax.random.uniform(k_w3, (C_OUT, C_IN), jnp.float32, -bound, bound)

    out = le_conv_forward(source, community, w1, w2, w3)
    out = jax.block_until_ready(out)

    ref = reference_forward(source, community, w1, w2, w3)
    assert out.shape == (N, C_OUT)
    assert jnp.allclose(out, ref, atol=1e-4, rtol=1e-4)

    print("KERNEL_OK")
</pallas_src>

<mosaic_0001>
module attributes {stable_mosaic.version = 11 : i64} {
  func.func @le_conv_kernel(%arg0: i32, %arg1: memref<64x128xf32, #tpu.memory_space<vmem>>, %arg2: memref<64x512xf32, #tpu.memory_space<vmem>>, %arg3: memref<128x128xf32, #tpu.memory_space<vmem>>, %arg4: memref<128x128xf32, #tpu.memory_space<vmem>>, %arg5: memref<64x128xf32, #tpu.memory_space<vmem>>) attributes {dimension_semantics = [#tpu.dimension_semantics<parallel>], iteration_bounds = array<i64: 4>, scalar_prefetch = 0 : i64, scratch_operands = 0 : i64, tpu.core_type = #tpu.core_type<tc>, window_params = [{transform_indices = @transform_0, window_bounds = array<i64: 64, 128>}, {transform_indices = @transform_1, window_bounds = array<i64: 64, 512>}, {pipeline_mode = #tpu.pipeline_mode<synchronous>, transform_indices = @transform_2, window_bounds = array<i64: 128, 128>}, {pipeline_mode = #tpu.pipeline_mode<synchronous>, transform_indices = @transform_3, window_bounds = array<i64: 128, 128>}, {transform_indices = @transform_4, window_bounds = array<i64: 64, 128>}]} {
    %c0 = arith.constant 0 : index
    %c0_0 = arith.constant 0 : index
    %0 = vector.load %arg1[%c0, %c0_0] : memref<64x128xf32, #tpu.memory_space<vmem>>, vector<64x128xf32>
    %c0_1 = arith.constant 0 : index
    %c0_2 = arith.constant 0 : index
    %1 = vector.load %arg2[%c0_1, %c0_2] : memref<64x512xf32, #tpu.memory_space<vmem>>, vector<64x512xf32>
    %2 = vector.extract_strided_slice %1 {offsets = [0, 0], sizes = [64, 128], strides = [1, 1]} : vector<64x512xf32> to vector<64x128xf32>
    %3 = vector.extract_strided_slice %1 {offsets = [0, 128], sizes = [64, 128], strides = [1, 1]} : vector<64x512xf32> to vector<64x128xf32>
    %4 = arith.addf %2, %3 : vector<64x128xf32>
    %5 = vector.extract_strided_slice %1 {offsets = [0, 256], sizes = [64, 128], strides = [1, 1]} : vector<64x512xf32> to vector<64x128xf32>
    %6 = arith.addf %4, %5 : vector<64x128xf32>
    %7 = vector.extract_strided_slice %1 {offsets = [0, 384], sizes = [64, 128], strides = [1, 1]} : vector<64x512xf32> to vector<64x128xf32>
    %8 = arith.addf %6, %7 : vector<64x128xf32>
    %c0_3 = arith.constant 0 : index
    %c0_4 = arith.constant 0 : index
    %9 = vector.load %arg3[%c0_3, %c0_4] : memref<128x128xf32, #tpu.memory_space<vmem>>, vector<128x128xf32>
    %c0_5 = arith.constant 0 : index
    %c0_6 = arith.constant 0 : index
    %10 = vector.load %arg4[%c0_5, %c0_6] : memref<128x128xf32, #tpu.memory_space<vmem>>, vector<128x128xf32>
    %cst = arith.constant dense<0.000000e+00> : vector<64x128xf32>
    %11 = tpu.matmul %0, %9, %cst {dimension_numbers = #tpu.dot_dimension_numbers<[1], [0], [0], [1], [0, 0, 1, 1], [], []>} : vector<64x128xf32>, vector<128x128xf32>, vector<64x128xf32> -> vector<64x128xf32>
    %cst_7 = arith.constant dense<0.000000e+00> : vector<64x128xf32>
    %12 = tpu.matmul %8, %10, %cst_7 {dimension_numbers = #tpu.dot_dimension_numbers<[1], [0], [0], [1], [0, 0, 1, 1], [], []>} : vector<64x128xf32>, vector<128x128xf32>, vector<64x128xf32> -> vector<64x128xf32>
    %13 = arith.subf %11, %12 : vector<64x128xf32>
    %c0_8 = arith.constant 0 : index
    %c0_9 = arith.constant 0 : index
    %14 = vector.load %arg5[%c0_8, %c0_9] : memref<64x128xf32, #tpu.memory_space<vmem>>, vector<64x128xf32>
    tpu.vector_store %arg5[%c0_8, %c0_9], %13 {strides = array<i32>} : memref<64x128xf32, #tpu.memory_space<vmem>>, vector<64x128xf32>,
    return
  }
  func.func @transform_0(%arg0: i32) -> (i32, i32) {
    %c0_i32 = arith.constant 0 : i32
    %c0_i32_0 = arith.constant 0 : i32
    return %arg0, %c0_i32 : i32, i32
  }
  func.func @transform_1(%arg0: i32) -> (i32, i32) {
    %c0_i32 = arith.constant 0 : i32
    %c0_i32_0 = arith.constant 0 : i32
    return %arg0, %c0_i32 : i32, i32
  }
  func.func @transform_2(%arg0: i32) -> (i32, i32) {
    %c0_i32 = arith.constant 0 : i32
    %c0_i32_0 = arith.constant 0 : i32
    %c0_i32_1 = arith.constant 0 : i32
    return %c0_i32, %c0_i32_0 : i32, i32
  }
  func.func @transform_3(%arg0: i32) -> (i32, i32) {
    %c0_i32 = arith.constant 0 : i32
    %c0_i32_0 = arith.constant 0 : i32
    %c0_i32_1 = arith.constant 0 : i32
    return %c0_i32, %c0_i32_0 : i32, i32
  }
  func.func @transform_4(%arg0: i32) -> (i32, i32) {
    %c0_i32 = arith.constant 0 : i32
    %c0_i32_0 = arith.constant 0 : i32
    return %arg0, %c0_i32 : i32, i32
  }
}

</mosaic_0001>

<bundles_post_ra>
// kernel: tpu_custom_call.1
= control target key start
LH: loop header
LB: loop body
LE: loop exit
PB: predicated region body
PF: predicated region fallthrough
CT: control target
= control target key end

     0   :  { %s1612_s0 = inlined_call_operand.hbm [shape: f32[256,128], index: 0, kind: input, shape index: {}]   ;;  %s1613_s1 = inlined_call_operand.hbm [shape: f32[256,512], index: 1, kind: input, shape index: {}]   ;;  %s1614_s2 = inlined_call_operand.hbm [shape: f32[128,128], index: 2, kind: input, shape index: {}]   ;;  %s1615_s3 = inlined_call_operand.hbm [shape: f32[128,128], index: 3, kind: input, shape index: {}]   ;;  %s1616_s4 = inlined_call_operand.hbm [shape: f32[256,128], index: 4, kind: output, shape index: {}]  }
   0x1   :  { %1620 = sst [smem:[#allocation16_spill]] %s1612_s0 }
   0x2   :  { %1621 = sst [smem:[#allocation17_spill]] %s1614_s2 }
   0x3   :  { %9 = vsyncpa [#allocation3], 0 }
   0x4   :  { %11 = vsyncpa [#allocation3 + $0x1], 0 }
   0x5   :  { %12 = vsyncpa [#allocation6], 0 }
   0x6   :  { %14 = vsyncpa [#allocation6 + $0x1], 0 }
   0x7   :  { %15 = vsyncpa [#allocation9], 0 }
   0x8   :  { %16 = vsyncpa [#allocation4], 0 }
   0x9   :  { %18 = vsyncpa [#allocation4 + $0x1], 0  ;;  %s1277_s15 = smov 0   ;;  %s1279_s16 = smov 0  }
   0xa   :  { %s1281_s17 = smov 0   ;;  %s1283_s18 = smov 0  }
   0xb LB: > { %s1298_s19 = sadd.s32 4294967295, %s1239_s18   ;;  %s740_s20 = sadd.s32 4294967294, %s1239_s18   ;;  %s1239_s18 = sphi %s1283_s18, %s1642_s18   ;;  %s1235_s17 = sphi %s1281_s17, %s1641_s17   ;;  %s1231_s16 = sphi %s1279_s16, %s1640_s16   ;;  %s1227_s15 = sphi %s1277_s15, %s1639_s15  }
   0xc   : > { %p44_p0 = scmp.ne.s32.totalorder %s1231_s16, %s1227_s15  ;;  %p1617_p1 = scmp.eq.s32.totalorder %s1298_s19, 0 }
   0xd   : > { %p142_p3 = scmp.eq.s32.totalorder %s740_s20, 3  ;;  %p741_p5 = scmp.ge.s32.totalorder %s1239_s18, 1 }
   0xe   : > { %p1307_p4 = por %p1617_p1, %p44_p0  ;;  %p149_p7 = scmp.lt.s32.totalorder %s1239_s18, 5 }
   0xf   : > { %p1312_p6 = por %p142_p3, %p44_p0  ;;  %s1241_s24 = smov [#allocation7]  }
  0x10   : > { %s1622_s21 = scalar_select %p1307_p4, 1, 0 }
  0x11   : > { %s1623_s22 = scalar_select %p1312_p6, 1, 0 }
  0x12   : > { %p1317_p8 = pnand %p741_p5, %p149_p7  ;;  %s161_s25 = sshll.u32 %s1241_s24, 4  ;;  %s162_s25 = int_to_ptr.vmem [resolvable:$true] %s161_s25 }
  0x13   : > { %s1242_s27 = smov [#allocation8]   ;;  %s1626_s2 = sld [smem:[#allocation17_spill]] }
  0x14   : > { %s1624_s23 = scalar_select %p1317_p8, 1, 0 }
  0x15   : > { %p981_p9 = pneg %p1317_p8  ;;  %s174_s28 = sshll.u32 %s1242_s27, 4  ;;  %s1329_s28 = int_to_ptr.vmem [resolvable:$true] %s174_s28 }
  0x17   : > { %p1325_p10 = pnand %p981_p9, %p1617_p1 }
  0x19   : > { %s1045_s5 = scalar_lea.hbm %s1626_s2, 2048  ;;  %p1047_p12 = pneg %p1325_p10 }
  0x1a   : > { %p1046_p11 = scmp.ne.s32.totalorder %s1626_s2, %s1045_s5  ;;  %p1052_p3 = scmp.lt.u32.totalorder %s1045_s5, %s1626_s2 }
  0x1c   : > { %p1048_p13 = pnand %p1047_p12, %p1046_p11 }
  0x1e   : > { %p1049_p0 = pneg %p1048_p13 }
  0x20   : > { %p1054_p5 = pnand %p1052_p3, %p1049_p0 }
  0x22   : > { %1057 = shalt.err (!%p1054_p5)
}
  0x23   : > { %s1058_s10 = scalar_lea.vmem %s162_s25, 2048  ;;  %p1066_p2 = scmp.lt.s32.totalorder %s162_s25, %s162_s25 }
  0x24   : > { %p1059_p7 = scmp.ne.s32.totalorder %s162_s25, %s1058_s10  ;;  %p1067_p6 = scmp.lt.s32.totalorder %s1058_s10, %s1058_s10 }
  0x26   : > { %p1061_p9 = pnand %p1059_p7, %p1047_p12  ;;  %p1068_p4 = por %p1067_p6, %p1066_p2 }
  0x28   : > { %p1062_p1 = pneg %p1061_p9 }
  0x2a   : > { %p1069_p8 = pnand %p1068_p4, %p1062_p1 }
  0x2c   : > { %1072 = shalt.err (!%p1069_p8)
}
  0x2d   : > { %s1243_s11 = smov 128   ;;  %s1244_s12 = smov 8  }
  0x2e   : > { %984 = dma.hbm_to_vmem [thread:$0]  (!%p1325_p10), %s1626_s2, 2048, %s162_s25, [#allocation6], %s1243_s11, %s1243_s11, %s1244_s12  }
  0x2f   : > { %s1073_s27 = scalar_lea.hbm %s1615_s3, 2048 }
  0x30   : > { %p1074_p1 = scmp.ne.s32.totalorder %s1615_s3, %s1073_s27  ;;  %p1080_p6 = scmp.lt.u32.totalorder %s1073_s27, %s1615_s3 }
  0x32   : > { %p1076_p2 = pnand %p1074_p1, %p1047_p12 }
  0x34   : > { %p1077_p4 = pneg %p1076_p2 }
  0x36   : > { %p1082_p8 = pnand %p1080_p6, %p1077_p4 }
  0x38   : > { %1085 = shalt.err (!%p1082_p8)
}
  0x39   : > { %s1086_s25 = scalar_lea.vmem %s1329_s28, 2048  ;;  %p1094_p3 = scmp.lt.s32.totalorder %s1329_s28, %s1329_s28 }
  0x3a   : > { %p1087_p11 = scmp.ne.s32.totalorder %s1329_s28, %s1086_s25  ;;  %p1095_p5 = scmp.lt.s32.totalorder %s1086_s25, %s1086_s25 }
  0x3c   : > { %p1089_p13 = pnand %p1087_p11, %p1047_p12  ;;  %p1096_p7 = por %p1095_p5, %p1094_p3 }
  0x3e   : > { %p1090_p0 = pneg %p1089_p13 }
  0x40   : > { %p1097_p9 = pnand %p1096_p7, %p1090_p0 }
  0x42   : > { %1100 = shalt.err (!%p1097_p9)
}
  0x43   : > { %987 = dma.hbm_to_vmem [thread:$0]  (!%p1325_p10), %s1615_s3, 2048, %s1329_s28, [#allocation9], %s1243_s11, %s1243_s11, %s1244_s12  }
  0x44   : > { %s1385_s26 = sadd.s32 1, %s1239_s18   ;;  %s31_s9 = sadd.s32 1, %s1235_s17 }
  0x45   : > { %s28_s10 = ssub.s32 %s1239_s18, %s1385_s26  ;;  %p38_p12 = scmp.ne.s32.totalorder %s1235_s17, %s1231_s16 }
  0x46   : > { %p29_p1 = scmp.eq.s32.totalorder %s28_s10, 0  ;;  %p39_p2 = scmp.eq.s32.totalorder %s1239_s18, 0 }
  0x47   : > { %p1627_p4 = scmp.eq.s32.totalorder %s1298_s19, 3  ;;  %p1001_p8 = scmp.lt.s32.totalorder %s1239_s18, 4 }
  0x48   : > { %s1401_s14 = scalar_select %p29_p1, %s1235_s17, %s31_s9  }
  0x49   : > { %p1395_p6 = por %p1627_p4, %p38_p12  ;;  %p40_p11 = por %p39_p2, %p38_p12 }
  0x4a   : > { %s1404_s20 = sand.u32 1, %s1235_s17   ;;  %s763_s24 = sshll.u32 %s1239_s18, 10 }
  0x4b   : > { %s745_s28 = sshll.u32 %s1404_s20, 6  ;;  %s1629_s0 = sld [smem:[#allocation16_spill]] }
  0x4c   : > { %s192_s5 = scalar_lea.vmem [#allocation2], %s745_s28  ;;  %p1415_p10 = pnand %p1001_p8, %p40_p11 }
  0x4d   : > { %s199_s6 = sshll.u32 %s192_s5, 4  ;;  %s748_s8 = sshll.u32 %s1404_s20, 8  ;;  %s1413_s6 = int_to_ptr.vmem [resolvable:$true] %s199_s6 }
  0x4e   : > { %s189_s9 = scalar_lea.sflag [#allocation3], %s1404_s20  ;;  %p1103_p0 = pneg %p1415_p10 }
  0x51   : > { %s1411_s30 = scalar_lea.hbm %s1629_s0, %s763_s24  ;;  %s1106_s27 = scalar_lea.hbm %s1629_s0, 4096 }
  0x52   : > { %s1101_s10 = scalar_lea.hbm %s1411_s30, 1024  ;;  %p1107_p7 = scmp.lt.u32.totalorder %s1411_s30, %s1629_s0 }
  0x53   : > { %p1102_p13 = scmp.ne.s32.totalorder %s1411_s30, %s1101_s10  ;;  %p1108_p9 = scmp.lt.u32.totalorder %s1106_s27, %s1101_s10 }
  0x54   : > { %p1110_p1 = scmp.lt.u32.totalorder %s1101_s10, %s1411_s30 }
  0x55   : > { %p1104_p3 = pnand %p1103_p0, %p1102_p13  ;;  %p1109_p12 = por %p1108_p9, %p1107_p7 }
  0x57   : > { %p1105_p5 = pneg %p1104_p3  ;;  %p1111_p2 = por %p1110_p1, %p1109_p12 }
  0x59   : > { %p1112_p4 = pnand %p1111_p2, %p1105_p5 }
  0x5b   : > { %1115 = shalt.err (!%p1112_p4)
}
  0x5c   : > { %s1116_s7 = scalar_lea.vmem %s1413_s6, 1024  ;;  %s1245_s28 = smov [#allocation2]  }
  0x5d   : > { %p1117_p8 = scmp.ne.s32.totalorder %s1413_s6, %s1116_s7  ;;  %s1121_s24 = sshll.u32 %s1245_s28, 4  ;;  %s1122_s24 = int_to_ptr.vmem [resolvable:$false] %s1121_s24 }
  0x5e   : > { %s1123_s29 = scalar_lea.vmem %s1122_s24, 2048  ;;  %p1124_p3 = scmp.lt.s32.totalorder %s1413_s6, %s1122_s24 }
  0x5f   : > { %p1119_p11 = pnand %p1117_p8, %p1103_p0  ;;  %p1125_p7 = scmp.lt.s32.totalorder %s1123_s29, %s1116_s7 }
  0x61   : > { %p1120_p13 = pneg %p1119_p11  ;;  %p1126_p9 = por %p1125_p7, %p1124_p3 }
  0x63   : > { %p1127_p12 = pnand %p1126_p9, %p1120_p13 }
  0x65   : > { %1130 = shalt.err (!%p1127_p12)
}
  0x66   : > { %991 = dma.hbm_to_vmem [thread:$0]  (!%p1415_p10), %s1411_s30, 1024, %s1413_s6, %s189_s9, %s1243_s11, %s1243_s11, %s1244_s12  }
  0x67   : > { %s765_s10 = sshll.u32 %s1239_s18, 12  ;;  %s213_s28 = scalar_lea.vmem [#allocation5], %s748_s8 }
  0x68   : > { %s1456_s5 = scalar_lea.hbm %s1613_s1, %s765_s10  ;;  %s221_s24 = sshll.u32 %s213_s28, 4  ;;  %s1460_s24 = int_to_ptr.vmem [resolvable:$true] %s221_s24 }
  0x69   : > { %s1631_s29 = sand.u32 1, %s1239_s18   ;;  %s1131_s2 = scalar_lea.hbm %s1456_s5, 4096 }
  0x6a   : > { %s1464_s0 = scalar_lea.sflag [#allocation6], %s1631_s29  ;;  %p1132_p5 = scmp.ne.s32.totalorder %s1456_s5, %s1131_s2 }
  0x6b   : > { %s1136_s20 = scalar_lea.hbm %s1613_s1, 16384  ;;  %p1137_p4 = scmp.lt.u32.totalorder %s1456_s5, %s1613_s1 }
  0x6c   : > { %p1134_p1 = pnand %p1132_p5, %p1103_p0  ;;  %p1138_p8 = scmp.lt.u32.totalorder %s1136_s20, %s1131_s2 }
  0x6d   : > { %p1140_p13 = scmp.lt.u32.totalorder %s1131_s2, %s1456_s5 }
  0x6e   : > { %p1135_p2 = pneg %p1134_p1  ;;  %p1139_p11 = por %p1138_p8, %p1137_p4 }
  0x70   : > { %p1141_p3 = por %p1140_p13, %p1139_p11 }
  0x72   : > { %p1142_p7 = pnand %p1141_p3, %p1135_p2 }
  0x74   : > { %1145 = shalt.err (!%p1142_p7)
}
  0x75   : > { %s1146_s8 = scalar_lea.vmem %s1460_s24, 4096  ;;  %s1246_s9 = smov [#allocation5]  }
  0x76   : > { %p1147_p9 = scmp.ne.s32.totalorder %s1460_s24, %s1146_s8  ;;  %s1151_s10 = sshll.u32 %s1246_s9, 4  ;;  %s1152_s10 = int_to_ptr.vmem [resolvable:$false] %s1151_s10 }
  0x77   : > { %s1153_s27 = scalar_lea.vmem %s1152_s10, 8192  ;;  %p1154_p1 = scmp.lt.s32.totalorder %s1460_s24, %s1152_s10 }
  0x78   : > { %p1149_p12 = pnand %p1147_p9, %p1103_p0  ;;  %p1155_p4 = scmp.lt.s32.totalorder %s1153_s27, %s1146_s8 }
  0x7a   : > { %p1150_p5 = pneg %p1149_p12  ;;  %p1156_p8 = por %p1155_p4, %p1154_p1 }
  0x7c   : > { %p1157_p11 = pnand %p1156_p8, %p1150_p5 }
  0x7e   : > { %1160 = shalt.err (!%p1157_p11)
}
  0x7f   : > { %s1247_s2 = smov 512   ;;  %s1248_s7 = smov 32  }
  0x80   : > { %994 = dma.hbm_to_vmem [thread:$0]  (!%p1415_p10), %s1456_s5, 4096, %s1460_s24, %s1464_s0, %s1247_s2, %s1247_s2, %s1248_s7  }
  0x81   : > { %p1632_p0 = scmp.ne.s32.totalorder %s1624_s23, 0 }
  0x82   : > { %s1493_s28 = sand.u32 (!%p1632_p0), 1, %s1231_s16   ;;  %p1633_p2 = scmp.ne.s32.totalorder (!%p1632_p0), %s1622_s21, 0 }
  0x83   : > { %233 = sbr.rel (%p1632_p0) target bundleno = 426 (0x1aa), region = 36  ;;  %s753_s29 = sshll.u32 (!%p1632_p0), %s1493_s28, 6 }
  0x84   : > { %s236_s11 = scalar_lea.sflag (!%p1632_p0), [#allocation3], %s1493_s28  ;;  %s1499_s12 = scalar_lea.vmem (!%p1632_p0), [#allocation2], %s753_s29 }
  0x8a   : > { %1206 = dma.done.wait (%p1633_p2), %s236_s11, 1024  }
  0x8b   : > { %1208 = vsyncadd (%p1633_p2), %s236_s11, 4294966272  ;;  %s244_s0 = sand.u32 1, %s1298_s19   ;;  %s754_s23 = sshll.u32 %s1493_s28, 8 }
  0x8c   : > { %s245_s25 = scalar_lea.sflag [#allocation6], %s244_s0  ;;  %s1507_s5 = scalar_lea.vmem [#allocation5], %s754_s23 }
  0x8d   : > { %1210 = dma.done.wait (%p1633_p2), %s245_s25, 4096  }
  0x8e   : > { %1212 = vsyncadd (%p1633_p2), %s245_s25, 4294963200  ;;  %p1634_p10 = scmp.eq.s32.totalorder %s1298_s19, 0 }
  0x90   : > { %1214 = dma.done.wait (%p1634_p10), [#allocation6], 2048   ;;  %p1635_p13 = pmov %p1634_p10 }
  0x91   : > { %p1636_p3 = pmov %p1634_p10 }
  0x92   : > { %1216 = vsyncadd (%p1635_p13), [#allocation6], 4294965248 }
  0x93   : > { %1218 = dma.done.wait (%p1636_p3), [#allocation9], 2048   ;;  %p1637_p7 = pmov %p1636_p3 }
  0x94   : > { %v353_v0 = vld [vmem:[#allocation7] sm:$0xff]  ;;  %v354_v1 = vld [vmem:[#allocation7 + $0x8] sm:$0xff]  ;;  %v355_v5 = vld [vmem:[#allocation7 + $0x10] sm:$0xff]  ;;  %s285_s21 = scalar_lea.vmem [#allocation10], %s753_s29  ;;  %s766_s20 = sshll.u32 %s1298_s19, 10 }
  0x95   : > { %1220 = vsyncadd (%p1637_p7), [#allocation9], 4294965248  ;;  %v369_v2 = vld [vmem:[#allocation8] sm:$0xff]  ;;  %v903_v3 = vpack.c.bf16 %v354_v1, %v353_v0  ;;  %v370_v4 = vld [vmem:[#allocation8 + $0x8] sm:$0xff]  ;;  %s625_s24 = sshll.u32 %s285_s21, 4  ;;  %s1569_s8 = scalar_lea.hbm %s1616_s4, %s766_s20  ;;  %s1564_s24 = int_to_ptr.vmem [resolvable:$true] %s625_s24 }
  0x96   : > { %v356_v6 = vld [vmem:[#allocation7 + $0x18] sm:$0xff]  ;;  %v935_v7 = vpack.c.bf16 %v370_v4, %v369_v2  ;;  %v371_v9 = vld [vmem:[#allocation8 + $0x10] sm:$0xff]  ;;  %v357_v11 = vld [vmem:[#allocation7 + $0x20] sm:$0xff]  ;;  %s612_s19 = scalar_lea.sflag [#allocation4], %s1493_s28  ;;  %s1161_s9 = scalar_lea.vmem %s1564_s24, 1024 }
  0x97   : > { %v907_v8 = vpack.c.bf16 %v356_v6, %v355_v5  ;;  %v372_v10 = vld [vmem:[#allocation8 + $0x18] sm:$0xff]  ;;  %904 = vmatprep.subr.bf16.mxu0 %v903_v3  ;;  %v358_v13 = vld [vmem:[#allocation7 + $0x28] sm:$0xff]  ;;  %v373_v14 = vld [vmem:[#allocation8 + $0x20] sm:$0xff]  ;;  %p1162_p9 = scmp.ne.s32.totalorder %s1564_s24, %s1161_s9  ;;  %s1249_s10 = smov [#allocation10]  }
  0x98   : > { %v939_v12 = vpack.c.bf16 %v372_v10, %v371_v9  ;;  %v374_v15 = vld [vmem:[#allocation8 + $0x28] sm:$0xff]  ;;  %936 = vmatprep.subr.bf16.mxu1 %v935_v7  ;;  %906 = vmatpush3.bf16.msra.mxu0 %v903_v3  ;;  %v911_v16 = vpack.c.bf16 %v358_v13, %v357_v11  ;;  %v359_v18 = vld [vmem:[#allocation7 + $0x30] sm:$0xff]  ;;  %v360_v19 = vld [vmem:[#allocation7 + $0x38] sm:$0xff]  ;;  %s1165_s27 = sshll.u32 %s1249_s10, 4  ;;  %s1166_s27 = int_to_ptr.vmem [resolvable:$false] %s1165_s27 }
  0x99   : > { %938 = vmatpush3.bf16.msra.mxu1 %v935_v7  ;;  %908 = vmatprep.subr.bf16.mxu0 %v907_v8  ;;  %v943_v17 = vpack.c.bf16 %v374_v15, %v373_v14  ;;  %v375_v20 = vld [vmem:[#allocation8 + $0x30] sm:$0xff]  ;;  %v376_v21 = vld [vmem:[#allocation8 + $0x38] sm:$0xff]  ;;  %v915_v22 = vpack.c.bf16 %v360_v19, %v359_v18  ;;  %v361_v23 = vld [vmem:[#allocation7 + $0x40] sm:$0xff]  ;;  %p1163_p12 = pnand %p1162_p9, %p1395_p6  ;;  %s1167_s2 = scalar_lea.vmem %s1166_s27, 2048 }
  0x9a   : > { %940 = vmatprep.subr.bf16.mxu1 %v939_v12  ;;  %v362_v24 = vld [vmem:[#allocation7 + $0x48] sm:$0xff]  ;;  %v947_v25 = vpack.c.bf16 %v376_v21, %v375_v20  ;;  %v377_v26 = vld [vmem:[#allocation8 + $0x40] sm:$0xff]  ;;  %v299_v31 = vld [vmem:[%s1507_s5 + $0x10] sm:$0xff]  ;;  %p1168_p1 = scmp.lt.s32.totalorder %s1564_s24, %s1166_s27  ;;  %p1169_p4 = scmp.lt.s32.totalorder %s1167_s2, %s1161_s9 }
  0x9b   : > { %v378_v27 = vld [vmem:[#allocation8 + $0x48] sm:$0xff]  ;;  %v289_v28 = vld [vmem:[%s1499_s12] sm:$0xff]  ;;  %v919_v33 = vpack.c.bf16 %v362_v24, %v361_v23  ;;  %v300_v34 = vld [vmem:[%s1507_s5 + $0x18] sm:$0xff]  ;;  %p1164_p5 = pneg %p1163_p12 }
  0x9c   : > { %910 = vmatpush3.bf16.msra.mxu0 %v907_v8  ;;  %847 = vmatprep.mubr.f32.mxu0 %v289_v28  ;;  %v297_v29 = vld [vmem:[%s1507_s5] sm:$0xff]  ;;  %v298_v30 = vld [vmem:[%s1507_s5 + $0x8] sm:$0xff]  ;;  %v951_v35 = vpack.c.bf16 %v378_v27, %v377_v26  ;;  %v363_v36 = vld [vmem:[#allocation7 + $0x50] sm:$0xff]  ;;  %p1170_p8 = por %p1169_p4, %p1168_p1 }
  0x9d   : > { %942 = vmatpush3.bf16.msra.mxu1 %v939_v12  ;;  %912 = vmatprep.subr.bf16.mxu0 %v911_v16  ;;  %v329_v32 = vadd.f32 %v298_v30, %v297_v29  ;;  %v364_v37 = vld [vmem:[#allocation7 + $0x58] sm:$0xff]  ;;  %v379_v39 = vld [vmem:[#allocation8 + $0x50] sm:$0xff]  ;;  %v365_v44 = vld [vmem:[#allocation7 + $0x60] sm:$0xff] }
  0x9e   : > { %944 = vmatprep.subr.bf16.mxu1 %v943_v17  ;;  %v380_v40 = vld [vmem:[#allocation8 + $0x58] sm:$0xff]  ;;  %v923_v42 = vpack.c.bf16 %v364_v37, %v363_v36  ;;  %v366_v45 = vld [vmem:[#allocation7 + $0x68] sm:$0xff]  ;;  %v381_v46 = vld [vmem:[#allocation8 + $0x60] sm:$0xff]  ;;  %p1171_p11 = pnand %p1170_p8, %p1164_p5 }
  0x9f   : > { %v337_v38 = vadd.f32 %v329_v32, %v299_v31  ;;  %v955_v43 = vpack.c.bf16 %v380_v40, %v379_v39  ;;  %v382_v47 = vld [vmem:[#allocation8 + $0x68] sm:$0xff]  ;;  %v927_v48 = vpack.c.bf16 %v366_v45, %v365_v44  ;;  %v367_v49 = vld [vmem:[#allocation7 + $0x70] sm:$0xff]  ;;  %v301_v50 = vld [vmem:[%s1507_s5 + $0x20] sm:$0xff] }
  0xa0   : > { %914 = vmatpush3.bf16.msra.mxu0 %v911_v16  ;;  %v302_v51 = vld [vmem:[%s1507_s5 + $0x28] sm:$0xff]  ;;  %v959_v52 = vpack.c.bf16 %v382_v47, %v381_v46  ;;  %v368_v53 = vld [vmem:[#allocation7 + $0x78] sm:$0xff]  ;;  %v305_v54 = vld [vmem:[%s1507_s5 + $0x40] sm:$0xff] }
  0xa1   : > { %946 = vmatpush3.bf16.msra.mxu1 %v943_v17  ;;  %916 = vmatprep.subr.bf16.mxu0 %v915_v22  ;;  %v345_v41 = vadd.f32 %v337_v38, %v300_v34  ;;  %v306_v55 = vld [vmem:[%s1507_s5 + $0x48] sm:$0xff]  ;;  %v383_v56 = vld [vmem:[#allocation8 + $0x70] sm:$0xff]  ;;  %v384_v57 = vld [vmem:[#allocation8 + $0x78] sm:$0xff]  ;;  %v330_v58 = vadd.f32 %v302_v51, %v301_v50  ;;  %v931_v59 = vpack.c.bf16 %v368_v53, %v367_v49 }
  0xa2   : > { %948 = vmatprep.subr.bf16.mxu1 %v947_v25  ;;  %v303_v60 = vld [vmem:[%s1507_s5 + $0x30] sm:$0xff]  ;;  %v331_v61 = vadd.f32 %v306_v55, %v305_v54  ;;  %v309_v62 = vld [vmem:[%s1507_s5 + $0x60] sm:$0xff]  ;;  %v310_v63 = vld [vmem:[%s1507_s5 + $0x68] sm:$0xff]  ;;  %v963_v0 = vpack.c.bf16 %v384_v57, %v383_v56 }
  0xa3   : > { %891 = vmatprep.mubr.f32.mxu1 %v345_v41  ;;  %v307_v1 = vld [vmem:[%s1507_s5 + $0x50] sm:$0xff]  ;;  %v313_v2 = vld [vmem:[%s1507_s5 + $0x80] sm:$0xff]  ;;  %v314_v3 = vld [vmem:[%s1507_s5 + $0x88] sm:$0xff]  ;;  %v338_v5 = vadd.f32 %v330_v58, %v303_v60  ;;  %v332_v7 = vadd.f32 %v310_v63, %v309_v62 }
  0xa4   : > { %918 = vmatpush3.bf16.msra.mxu0 %v915_v22  ;;  %v304_v4 = vld [vmem:[%s1507_s5 + $0x38] sm:$0xff]  ;;  %v339_v8 = vadd.f32 %v331_v61, %v307_v1  ;;  %v311_v9 = vld [vmem:[%s1507_s5 + $0x70] sm:$0xff]  ;;  %v333_v10 = vadd.f32 %v314_v3, %v313_v2  ;;  %v317_v11 = vld [vmem:[%s1507_s5 + $0xa0] sm:$0xff] }
  0xa5   : > { %950 = vmatpush3.bf16.msra.mxu1 %v947_v25  ;;  %920 = vmatprep.subr.bf16.mxu0 %v919_v33  ;;  %v308_v6 = vld [vmem:[%s1507_s5 + $0x58] sm:$0xff]  ;;  %v318_v12 = vld [vmem:[%s1507_s5 + $0xa8] sm:$0xff]  ;;  %v315_v13 = vld [vmem:[%s1507_s5 + $0x90] sm:$0xff]  ;;  %v346_v17 = vadd.f32 %v338_v5, %v304_v4  ;;  %v340_v20 = vadd.f32 %v332_v7, %v311_v9 }
  0xa6   : > { %952 = vmatprep.subr.bf16.mxu1 %v951_v35  ;;  %v321_v14 = vld [vmem:[%s1507_s5 + $0xc0] sm:$0xff]  ;;  %v322_v15 = vld [vmem:[%s1507_s5 + $0xc8] sm:$0xff]  ;;  %v291_v18 = vld [vmem:[%s1499_s12 + $0x10] sm:$0xff]  ;;  %v334_v21 = vadd.f32 %v318_v12, %v317_v11  ;;  %v347_v22 = vadd.f32 %v339_v8, %v308_v6  ;;  %v341_v23 = vadd.f32 %v333_v10, %v315_v13 }
  0xa7   : > { %v290_v16 = vld [vmem:[%s1499_s12 + $0x8] sm:$0xff]  ;;  %v312_v19 = vld [vmem:[%s1507_s5 + $0x78] sm:$0xff]  ;;  %v319_v24 = vld [vmem:[%s1507_s5 + $0xb0] sm:$0xff]  ;;  %v335_v25 = vadd.f32 %v322_v15, %v321_v14 }
  0xa8   : > { %922 = vmatpush3.bf16.msra.mxu0 %v919_v33  ;;  %v325_v26 = vld [vmem:[%s1507_s5 + $0xe0] sm:$0xff]  ;;  %v326_v27 = vld [vmem:[%s1507_s5 + $0xe8] sm:$0xff]  ;;  %v316_v28 = vld [vmem:[%s1507_s5 + $0x98] sm:$0xff]  ;;  %v348_v31 = vadd.f32 %v340_v20, %v312_v19  ;;  %v342_v32 = vadd.f32 %v334_v21, %v319_v24 }
  0xa9   : > { %954 = vmatpush3.bf16.msra.mxu1 %v951_v35  ;;  %924 = vmatprep.subr.bf16.mxu0 %v923_v42  ;;  %v323_v29 = vld [vmem:[%s1507_s5 + $0xd0] sm:$0xff]  ;;  %v292_v30 = vld [vmem:[%s1499_s12 + $0x18] sm:$0xff]  ;;  %v336_v33 = vadd.f32 %v326_v27, %v325_v26  ;;  %v293_v34 = vld [vmem:[%s1499_s12 + $0x20] sm:$0xff]  ;;  %v349_v35 = vadd.f32 %v341_v23, %v316_v28 }
  0xaa   : > { %956 = vmatprep.subr.bf16.mxu1 %v955_v43  ;;  %v320_v36 = vld [vmem:[%s1507_s5 + $0xb8] sm:$0xff]  ;;  %v343_v37 = vadd.f32 %v335_v25, %v323_v29  ;;  %v327_v38 = vld [vmem:[%s1507_s5 + $0xf0] sm:$0xff]  ;;  %v294_v40 = vld [vmem:[%s1499_s12 + $0x28] sm:$0xff] }
  0xab   : > { %v324_v39 = vld [vmem:[%s1507_s5 + $0xd8] sm:$0xff]  ;;  %v350_v41 = vadd.f32 %v342_v32, %v320_v36 }
  0xac   : > { %926 = vmatpush3.bf16.msra.mxu0 %v923_v42  ;;  %v344_v42 = vadd.f32 %v336_v33, %v327_v38  ;;  %v351_v44 = vadd.f32 %v343_v37, %v324_v39  ;;  %v328_v45 = vld [vmem:[%s1507_s5 + $0xf8] sm:$0xff] }
  0xad   : > { %958 = vmatpush3.bf16.msra.mxu1 %v955_v43  ;;  %928 = vmatprep.subr.bf16.mxu0 %v927_v48  ;;  %v295_v43 = vld [vmem:[%s1499_s12 + $0x30] sm:$0xff]  ;;  %v296_v46 = vld [vmem:[%s1499_s12 + $0x38] sm:$0xff] }
  0xae   : > { %960 = vmatprep.subr.bf16.mxu1 %v959_v52  ;;  %v352_v47 = vadd.f32 %v344_v42, %v328_v45 }
  0xb0   : > { %930 = vmatpush3.bf16.msra.mxu0 %v927_v48 }
  0xb1   : > { %962 = vmatpush3.bf16.msra.mxu1 %v959_v52  ;;  %932 = vmatprep.subr.bf16.mxu0 %v931_v59 }
  0xb2   : > { %964 = vmatprep.subr.bf16.mxu1 %v963_v0 }
  0xb4   : > { %934 = vmatpush3.bf16.msra.mxu0 %v931_v59 }
  0xb5   : > { %966 = vmatpush3.bf16.msra.mxu1 %v963_v0 }
  0xb7   : > { %848 = vmatmul.mubr.f32.vlgmr.msra.gmra.mrb[0].mxu0 %v290_v16 }
  0xb8   : > { %892 = vmatmul.mubr.f32.vlgmr.msra.gmra.mrb[0].mxu1 %v346_v17  ;;  %850 = vmatprep.mubr.f32.mxu0 %v291_v18 }
  0xb9   : > { %894 = vmatprep.mubr.f32.mxu1 %v347_v22 }
  0xbb   : > { %851 = vmatmul.mubr.f32.gmra.mrb[2].mxu0 %v292_v30 }
  0xbc   : > { %895 = vmatmul.mubr.f32.gmra.mrb[2].mxu1 %v348_v31  ;;  %853 = vmatprep.mubr.f32.mxu0 %v293_v34 }
  0xbd   : > { %897 = vmatprep.mubr.f32.mxu1 %v349_v35 }
  0xbf   : > { %854 = vmatmul.mubr.f32.gmra.mrb[4].mxu0 %v294_v40 }
  0xc0   : > { %898 = vmatmul.mubr.f32.gmra.mrb[4].mxu1 %v350_v41  ;;  %856 = vmatprep.mubr.f32.mxu0 %v295_v43 }
  0xc1   : > { %900 = vmatprep.mubr.f32.mxu1 %v351_v44 }
  0xc3   : > { %857 = vmatmul.mubr.f32.gmra.mrb[6].mxu0 %v296_v46 }
  0xc4   : > { %901 = vmatmul.mubr.f32.gmra.mrb[6].mxu1 %v352_v47 }
 0x18a   : > { %v849_v48 = vpop.f32.mrb[0].mxu0 }
 0x18b   : > { %v893_v49 = vpop.f32.mrb[0].mxu1  ;;  %v451_v50 = vpop.f32.mrb[1].mxu0 }
 0x18c   : > { %v596_v51 = vsub.f32 %v849_v48, %v893_v49  ;;  %v556_v52 = vpop.f32.mrb[1].mxu1 }
 0x18d   : > { %v595_v53 = vsub.f32 %v451_v50, %v556_v52 }
 0x18e   : > { %604 = vst [vmem:[%s285_s21 + $0x8] sm:$0xff] %v596_v51  ;;  %v852_v54 = vpop.f32.mrb[2].mxu0 }
 0x18f   : > { %603 = vst [vmem:[%s285_s21] sm:$0xff] %v595_v53  ;;  %v896_v55 = vpop.f32.mrb[2].mxu1  ;;  %v461_v56 = vpop.f32.mrb[3].mxu0 }
 0x190   : > { %v598_v57 = vsub.f32 %v852_v54, %v896_v55  ;;  %v566_v58 = vpop.f32.mrb[3].mxu1 }
 0x191   : > { %v597_v59 = vsub.f32 %v461_v56, %v566_v58 }
 0x192   : > { %606 = vst [vmem:[%s285_s21 + $0x18] sm:$0xff] %v598_v57  ;;  %v855_v60 = vpop.f32.mrb[4].mxu0 }
 0x193   : > { %605 = vst [vmem:[%s285_s21 + $0x10] sm:$0xff] %v597_v59  ;;  %v899_v61 = vpop.f32.mrb[4].mxu1  ;;  %v471_v62 = vpop.f32.mrb[5].mxu0 }
 0x194   : > { %v600_v63 = vsub.f32 %v855_v60, %v899_v61  ;;  %v576_v0 = vpop.f32.mrb[5].mxu1 }
 0x195   : > { %v599_v1 = vsub.f32 %v471_v62, %v576_v0 }
 0x196   : > { %608 = vst [vmem:[%s285_s21 + $0x28] sm:$0xff] %v600_v63  ;;  %v858_v2 = vpop.f32.mrb[6].mxu0 }
 0x197   : > { %607 = vst [vmem:[%s285_s21 + $0x20] sm:$0xff] %v599_v1  ;;  %v902_v3 = vpop.f32.mrb[6].mxu1  ;;  %v481_v4 = vpop.f32.mrb[7].mxu0 }
 0x198   : > { %v602_v5 = vsub.f32 %v858_v2, %v902_v3  ;;  %v586_v6 = vpop.f32.mrb[7].mxu1 }
 0x199   : > { %v601_v7 = vsub.f32 %v481_v4, %v586_v6 }
 0x19a   : > { %610 = vst [vmem:[%s285_s21 + $0x38] sm:$0xff] %v602_v5 }
 0x19b   : > { %609 = vst [vmem:[%s285_s21 + $0x30] sm:$0xff] %v601_v7 }
 0x19c   : > { %1174 = shalt.err (!%p1171_p11)
}
 0x19d   : > { %s1175_s7 = scalar_lea.hbm %s1569_s8, 1024  ;;  %s1179_s12 = scalar_lea.hbm %s1616_s4, 4096 }
 0x19e   : > { %p1176_p0 = scmp.ne.s32.totalorder %s1569_s8, %s1175_s7  ;;  %p1180_p13 = scmp.lt.u32.totalorder %s1569_s8, %s1616_s4 }
 0x19f   : > { %p1181_p3 = scmp.lt.u32.totalorder %s1179_s12, %s1175_s7  ;;  %p1183_p9 = scmp.lt.u32.totalorder %s1175_s7, %s1569_s8 }
 0x1a0   : > { %p1177_p2 = pnand %p1176_p0, %p1395_p6 }
 0x1a1   : > { %p1182_p7 = por %p1181_p3, %p1180_p13 }
 0x1a2   : > { %p1178_p10 = pneg %p1177_p2 }
 0x1a3   : > { %p1184_p12 = por %p1183_p9, %p1182_p7 }
 0x1a5   : > { %p1185_p5 = pnand %p1184_p12, %p1178_p10 }
 0x1a7   : > { %1188 = shalt.err (!%p1185_p5)
}
 0x1a8   : > { %s1250_s25 = smov 128   ;;  %s1251_s5 = smov 8  }
 0x1a9   : > { %979 = dma.vmem_to_hbm [thread:$0]  (%p1395_p6), %s1564_s24, 1024, %s1569_s8, %s612_s19, %s1250_s25, %s1250_s25, %s1251_s5  }
 0x1aa PF: > { %p1004_p1 = scmp.ge.s32.totalorder %s1239_s18, 2  ;;  %s640_s21 = sand.u32 1, %s1227_s15  }
 0x1ab   : > { %p1638_p4 = scmp.ne.s32.totalorder %s1623_s22, 0  ;;  %s641_s20 = scalar_lea.sflag [#allocation4], %s640_s21 }
 0x1ad   : > { %p996_p8 = pnand %p1004_p1, %p1638_p4 }
 0x1af   : > { %1222 = dma.done.wait (!%p996_p8), %s641_s20, 1024  }
 0x1b0   : > { %1224 = vsyncadd (!%p996_p8), %s641_s20, 4294966272  ;;  %p21_p11 = scmp.ge.s32.totalorder %s1385_s26, 6   ;;  %s1639_s15 = smov %s1231_s16 }
 0x1b1   : > { %s1640_s16 = smov %s1235_s17  ;;  %s1641_s17 = smov %s1401_s14 }
 0x1b2   : > { %s1642_s18 = smov %s1385_s26  ;;  %23 = sbr.rel (!%p21_p11) target bundleno = 11 (0xb), region = 102 }
 0x1b9   :  { %646 = vsyncpa [#allocation3], 1 }
 0x1ba   :  { %648 = vsyncpa [#allocation3 + $0x1], 1 }
 0x1bb   :  { %649 = vsyncpa [#allocation6], 1 }
 0x1bc   :  { %651 = vsyncpa [#allocation6 + $0x1], 1 }
 0x1bd   :  { %652 = vsyncpa [#allocation9], 1 }
 0x1be   :  { %653 = vsyncpa [#allocation4], 1 }
 0x1bf   :  { %655 = vsyncpa [#allocation4 + $0x1], 1 }

</bundles_post_ra>
